<compile_context>
chip_gen: v7x
topology: tpu7x:2x2x1
jax: 0.10.0
libtpu: 0.0.40
codegen_flags: <defaults>
</compile_context>

<pallas_src>
import functools
import math

import jax
import jax.numpy as jnp
from jax import lax
from jax.experimental import pallas as pl
from jax.experimental.pallas import tpu as pltpu


# ---------------------------------------------------------------------------
# Reference table construction (mirrors torch __init__; used for validation
# and for the non-lane-friendly-E fallback path).
# ---------------------------------------------------------------------------
def build_sine_cosine_table(embedding_size: int, max_len: int = 1000) -> jnp.ndarray:
    position = jnp.arange(0, max_len, dtype=jnp.float32)[:, None]             # (max_len, 1)
    div_term = jnp.exp(
        jnp.arange(0, embedding_size, 2, dtype=jnp.float32)
        * -(math.log(10000.0) / embedding_size)
    )                                                                          # (E/2,)
    enc = jnp.zeros((max_len, embedding_size), dtype=jnp.float32)
    enc = enc.at[:, 0::2].set(jnp.sin(position * div_term))
    enc = enc.at[:, 1::2].set(jnp.cos(position * div_term))
    return enc


def _round_up(v: int, m: int) -> int:
    return ((v + m - 1) // m) * m


# ---------------------------------------------------------------------------
# Pallas kernel: compute the packed encoding block directly.
#   out[r, g*E + e] = sin/cos( idx[r, g] * div_term[e//2] )   (sin for even e, cos for odd e)
# All ops are full-vreg VALU work; no scalar loads, no dynamic addressing.
# ---------------------------------------------------------------------------
def _sincos_encode_kernel(idx_ref, coef_ref, out_ref, *, emb: int, pack: int, max_len: int):
    # idx_ref  : VMEM (tile_p, pack) int32   -- positions, PACK per packed output row
    # coef_ref : VMEM (1, pack*emb) float32  -- div_term[(lane % emb)//2], lane-replicated
    # out_ref  : VMEM (tile_p, pack*emb) f32 -- lane-dense packed encodings
    tile_p, lane_w = out_ref.shape

    lane = lax.broadcasted_iota(jnp.int32, (1, lane_w), 1)        # single vreg row
    is_cos = lane & 1        # emb is even, so parity of (lane % emb) == parity of lane

    # ---- expand (tile_p, pack) positions to (tile_p, lane_w): one value per lane group
    pos_cols = idx_ref[...].astype(jnp.float32)
    pos_cols = jnp.clip(pos_cols, 0.0, float(max_len - 1))        # clamp OOB (torch raises)
    pos = jnp.broadcast_to(pos_cols[:, 0:1], (tile_p, lane_w))
    for g in range(1, pack):                                      # static, tiny unroll
        pos = jnp.where(
            lane >= g * emb,
            jnp.broadcast_to(pos_cols[:, g:g + 1], (tile_p, lane_w)),
            pos,
        )

    theta = pos * coef_ref[...]                                   # theta in [0, max_len)

    # ---- argument reduction: theta = n*(pi/2) + r, |r| <= ~pi/4 (Cody-Waite, f32-safe
    #      for theta up to a few thousand since n*C1 / n*C2 products are exact)
    n = (theta * 0.6366197723675814 + 0.5).astype(jnp.int32)      # theta >= 0 -> trunc==floor
    n_f = n.astype(jnp.float32)
    r = theta - n_f * 1.5703125
    r = r - n_f * 4.837512969970703125e-4
    r = r - n_f * 7.5497899548918821e-8

    # ---- minimax polynomials on |r| <= pi/4 (Cephes sinf/cosf coefficients)
    z = r * r
    sin_r = ((-1.9515295891e-4 * z + 8.3321608736e-3) * z - 1.6666654611e-1) * z * r + r
    cos_r = ((2.443315711809948e-5 * z - 1.388731625493765e-3) * z
             + 4.166664568298827e-2) * z * z - 0.5 * z + 1.0

    # ---- quadrant selection; cos(theta) = sin(theta + pi/2) handled by shifting n by 1
    q = (n + is_cos) & 3
    val = jnp.where((q & 1) == 1, cos_r, sin_r)
    out_ref[...] = jnp.where(q >= 2, -val, val)


# ---------------------------------------------------------------------------
# Module constructor: precompute per-lane frequency row once; return forward().
# ---------------------------------------------------------------------------
def make_sine_cosine_encoding(embedding_size: int, max_len: int = 1000,
                              max_tile_packed_rows: int = 1024):
    emb = embedding_size

    if emb % 2 != 0 or (128 % emb != 0 and emb % 128 != 0):
        # TODO(synk): embedding sizes that don't pack cleanly into 128 lanes fall back to a
        # plain XLA gather from the precomputed table instead of a padded/masked Pallas path.
        table = build_sine_cosine_table(emb, max_len)

        def forward_fallback(x):
            idx = jnp.clip(x.astype(jnp.int32), 0, max_len - 1)
            return table[idx]

        return forward_fallback

    pack = 128 // emb if emb < 128 else 1          # positions packed per 128-lane output row
    lane_w = pack * emb

    # Same expression as the table builder -> identical f32 div_term -> identical theta.
    div_term = jnp.exp(
        jnp.arange(0, emb, 2, dtype=jnp.float32) * -(math.log(10000.0) / emb)
    )
    coef_row = jnp.tile(jnp.repeat(div_term, 2), pack).reshape(1, lane_w)   # built once

    max_tile = max(8, (max_tile_packed_rows // 8) * 8)
    kernel = functools.partial(_sincos_encode_kernel, emb=emb, pack=pack, max_len=max_len)

    def forward(x):
        orig_shape = x.shape
        flat_idx = x.reshape(-1).astype(jnp.int32)
        n = flat_idx.shape[0]
        if n == 0:
            return jnp.zeros(orig_shape + (emb,), jnp.float32)

        packed_rows = pl.cdiv(n, pack)
        if packed_rows <= max_tile:
            tile_p, num_tiles = packed_rows, 1
        else:
            # Prefer a tile that divides the 8-rounded row count so no padded tail is
            # produced (keeps the final [:n] slice a no-op for n % (8*pack) == 0).
            padded8 = _round_up(packed_rows, 8)
            tile_p = max_tile
            for cand in range(max_tile, max_tile // 2 - 1, -8):
                if padded8 % cand == 0:
                    tile_p = cand
                    break
            num_tiles = pl.cdiv(padded8, tile_p)
        total_packed = num_tiles * tile_p
        n_pad = total_packed * pack

        if n_pad != n:
            flat_idx = jnp.pad(flat_idx, (0, n_pad - n))          # pad rows -> position 0
        idx2d = flat_idx.reshape(total_packed, pack)

        out_packed = pl.pallas_call(
            kernel,
            out_shape=jax.ShapeDtypeStruct((total_packed, lane_w), jnp.float32),
            grid=(num_tiles,),
            in_specs=[
                pl.BlockSpec((tile_p, pack), lambda i: (i, 0)),   # per-tile indices (pipelined)
                pl.BlockSpec((1, lane_w), lambda i: (0, 0)),      # constant frequency row
            ],
            out_specs=pl.BlockSpec((tile_p, lane_w), lambda i: (i, 0)),
            compiler_params=pltpu.CompilerParams(
                dimension_semantics=("parallel",),                # v7x: shard tiles over 2 TCs
            ),
        )(idx2d, coef_row)

        # Packed (P, pack*E) slab is exactly the contiguous flat output in row-major order.
        out_flat = out_packed.reshape(n_pad, emb)
        if n_pad != n:
            out_flat = out_flat[:n]
        return out_flat.reshape(orig_shape + (emb,))

    return forward


# ---------------------------------------------------------------------------
# Demo / self-check
# ---------------------------------------------------------------------------
if __name__ == "__main__":
    EMBEDDING_SIZE = 32
    MAX_LEN = 1000
    B, S = 2, 8

    forward = make_sine_cosine_encoding(EMBEDDING_SIZE, MAX_LEN)

    key = jax.random.PRNGKey(0)
    x = jax.random.randint(key, (B, S), minval=0, maxval=MAX_LEN, dtype=jnp.int32)

    out = jax.block_until_ready(jax.jit(forward)(x))

    # Reference: gather from the XLA-built table (what the PyTorch module returns).
    table = build_sine_cosine_table(EMBEDDING_SIZE, MAX_LEN)
    ref = table[x]

    assert out.shape == (B, S, EMBEDDING_SIZE), out.shape
    assert out.dtype == jnp.float32, out.dtype
    max_err = float(jnp.max(jnp.abs(out - ref)))
    assert max_err < 1e-5, f"max abs error vs table gather: {max_err}"

    print("KERNEL_OK")
</pallas_src>

<mosaic_0001>
module attributes {stable_mosaic.version = 11 : i64} {
  func.func @_sincos_encode_kernel(%arg0: i32, %arg1: memref<4x4xi32, #tpu.memory_space<vmem>>, %arg2: memref<1x128xf32, #tpu.memory_space<vmem>>, %arg3: memref<4x128xf32, #tpu.memory_space<vmem>>) attributes {dimension_semantics = [#tpu.dimension_semantics<parallel>], iteration_bounds = array<i64: 1>, scalar_prefetch = 0 : i64, scratch_operands = 0 : i64, tpu.core_type = #tpu.core_type<tc>, window_params = [{transform_indices = @transform_0, window_bounds = array<i64: 4, 4>}, {pipeline_mode = #tpu.pipeline_mode<synchronous>, transform_indices = @transform_1, window_bounds = array<i64: 1, 128>}, {transform_indices = @transform_2, window_bounds = array<i64: 4, 128>}]} {
    %0 = tpu.iota {dimensions = array<i32: 1>} : vector<1x128xi32>
    %c1_i32 = arith.constant 1 : i32
    %1 = vector.broadcast %c1_i32 : i32 to vector<1x128xi32>
    %2 = arith.andi %0, %1 : vector<1x128xi32>
    %c0 = arith.constant 0 : index
    %c0_0 = arith.constant 0 : index
    %3 = vector.load %arg1[%c0, %c0_0] : memref<4x4xi32, #tpu.memory_space<vmem>>, vector<4x4xi32>
    %4 = arith.sitofp %3 : vector<4x4xi32> to vector<4x4xf32>
    %cst = arith.constant 0.000000e+00 : f32
    %cst_1 = arith.constant 9.990000e+02 : f32
    %5 = vector.broadcast %cst : f32 to vector<4x4xf32>
    %6 = arith.maximumf %5, %4 : vector<4x4xf32>
    %7 = vector.broadcast %cst_1 : f32 to vector<4x4xf32>
    %8 = arith.minimumf %7, %6 : vector<4x4xf32>
    %9 = vector.extract_strided_slice %8 {offsets = [0, 0], sizes = [4, 1], strides = [1, 1]} : vector<4x4xf32> to vector<4x1xf32>
    %10 = vector.shape_cast %9 : vector<4x1xf32> to vector<4x1xf32>
    %11 = vector.broadcast %10 : vector<4x1xf32> to vector<4x128xf32>
    %c32_i32 = arith.constant 32 : i32
    %12 = vector.broadcast %c32_i32 : i32 to vector<1x128xi32>
    %13 = arith.cmpi sge, %0, %12 : vector<1x128xi32>
    %14 = vector.extract_strided_slice %8 {offsets = [0, 1], sizes = [4, 1], strides = [1, 1]} : vector<4x4xf32> to vector<4x1xf32>
    %15 = vector.shape_cast %14 : vector<4x1xf32> to vector<4x1xf32>
    %16 = vector.broadcast %15 : vector<4x1xf32> to vector<4x128xf32>
    %17 = vector.shape_cast %13 : vector<1x128xi1> to vector<1x128xi1>
    %18 = vector.broadcast %17 : vector<1x128xi1> to vector<4x128xi1>
    %19 = arith.select %18, %16, %11 : vector<4x128xi1>, vector<4x128xf32>
    %c64_i32 = arith.constant 64 : i32
    %20 = vector.broadcast %c64_i32 : i32 to vector<1x128xi32>
    %21 = arith.cmpi sge, %0, %20 : vector<1x128xi32>
    %22 = vector.extract_strided_slice %8 {offsets = [0, 2], sizes = [4, 1], strides = [1, 1]} : vector<4x4xf32> to vector<4x1xf32>
    %23 = vector.shape_cast %22 : vector<4x1xf32> to vector<4x1xf32>
    %24 = vector.broadcast %23 : vector<4x1xf32> to vector<4x128xf32>
    %25 = vector.shape_cast %21 : vector<1x128xi1> to vector<1x128xi1>
    %26 = vector.broadcast %25 : vector<1x128xi1> to vector<4x128xi1>
    %27 = arith.select %26, %24, %19 : vector<4x128xi1>, vector<4x128xf32>
    %c96_i32 = arith.constant 96 : i32
    %28 = vector.broadcast %c96_i32 : i32 to vector<1x128xi32>
    %29 = arith.cmpi sge, %0, %28 : vector<1x128xi32>
    %30 = vector.extract_strided_slice %8 {offsets = [0, 3], sizes = [4, 1], strides = [1, 1]} : vector<4x4xf32> to vector<4x1xf32>
    %31 = vector.shape_cast %30 : vector<4x1xf32> to vector<4x1xf32>
    %32 = vector.broadcast %31 : vector<4x1xf32> to vector<4x128xf32>
    %33 = vector.shape_cast %29 : vector<1x128xi1> to vector<1x128xi1>
    %34 = vector.broadcast %33 : vector<1x128xi1> to vector<4x128xi1>
    %35 = arith.select %34, %32, %27 : vector<4x128xi1>, vector<4x128xf32>
    %c0_2 = arith.constant 0 : index
    %c0_3 = arith.constant 0 : index
    %36 = vector.load %arg2[%c0_2, %c0_3] : memref<1x128xf32, #tpu.memory_space<vmem>>, vector<1x128xf32>
    %37 = vector.broadcast %36 : vector<1x128xf32> to vector<4x128xf32>
    %38 = arith.mulf %35, %37 : vector<4x128xf32>
    %cst_4 = arith.constant 0.636619746 : f32
    %39 = vector.broadcast %cst_4 : f32 to vector<4x128xf32>
    %40 = arith.mulf %38, %39 : vector<4x128xf32>
    %cst_5 = arith.constant 5.000000e-01 : f32
    %41 = vector.broadcast %cst_5 : f32 to vector<4x128xf32>
    %42 = arith.addf %40, %41 : vector<4x128xf32>
    %43 = arith.fptosi %42 : vector<4x128xf32> to vector<4x128xi32>
    %44 = arith.sitofp %43 : vector<4x128xi32> to vector<4x128xf32>
    %cst_6 = arith.constant 1.5703125 : f32
    %45 = vector.broadcast %cst_6 : f32 to vector<4x128xf32>
    %46 = arith.mulf %44, %45 : vector<4x128xf32>
    %47 = arith.subf %38, %46 : vector<4x128xf32>
    %cst_7 = arith.constant 4.83751297E-4 : f32
    %48 = vector.broadcast %cst_7 : f32 to vector<4x128xf32>
    %49 = arith.mulf %44, %48 : vector<4x128xf32>
    %50 = arith.subf %47, %49 : vector<4x128xf32>
    %cst_8 = arith.constant 7.549790e-08 : f32
    %51 = vector.broadcast %cst_8 : f32 to vector<4x128xf32>
    %52 = arith.mulf %44, %51 : vector<4x128xf32>
    %53 = arith.subf %50, %52 : vector<4x128xf32>
    %54 = arith.mulf %53, %53 : vector<4x128xf32>
    %cst_9 = arith.constant -1.95152956E-4 : f32
    %55 = vector.broadcast %cst_9 : f32 to vector<4x128xf32>
    %56 = arith.mulf %55, %54 : vector<4x128xf32>
    %cst_10 = arith.constant 0.00833216123 : f32
    %57 = vector.broadcast %cst_10 : f32 to vector<4x128xf32>
    %58 = arith.addf %56, %57 : vector<4x128xf32>
    %59 = arith.mulf %58, %54 : vector<4x128xf32>
    %cst_11 = arith.constant 0.166666552 : f32
    %60 = vector.broadcast %cst_11 : f32 to vector<4x128xf32>
    %61 = arith.subf %59, %60 : vector<4x128xf32>
    %62 = arith.mulf %61, %54 : vector<4x128xf32>
    %63 = arith.mulf %62, %53 : vector<4x128xf32>
    %64 = arith.addf %63, %53 : vector<4x128xf32>
    %cst_12 = arith.constant 2.44331568E-5 : f32
    %65 = vector.broadcast %cst_12 : f32 to vector<4x128xf32>
    %66 = arith.mulf %65, %54 : vector<4x128xf32>
    %cst_13 = arith.constant 0.00138873165 : f32
    %67 = vector.broadcast %cst_13 : f32 to vector<4x128xf32>
    %68 = arith.subf %66, %67 : vector<4x128xf32>
    %69 = arith.mulf %68, %54 : vector<4x128xf32>
    %cst_14 = arith.constant 0.0416666456 : f32
    %70 = vector.broadcast %cst_14 : f32 to vector<4x128xf32>
    %71 = arith.addf %69, %70 : vector<4x128xf32>
    %72 = arith.mulf %71, %54 : vector<4x128xf32>
    %73 = arith.mulf %72, %54 : vector<4x128xf32>
    %cst_15 = arith.constant 5.000000e-01 : f32
    %74 = vector.broadcast %cst_15 : f32 to vector<4x128xf32>
    %75 = arith.mulf %74, %54 : vector<4x128xf32>
    %76 = arith.subf %73, %75 : vector<4x128xf32>
    %cst_16 = arith.constant 1.000000e+00 : f32
    %77 = vector.broadcast %cst_16 : f32 to vector<4x128xf32>
    %78 = arith.addf %76, %77 : vector<4x128xf32>
    %79 = vector.broadcast %2 : vector<1x128xi32> to vector<4x128xi32>
    %80 = arith.addi %43, %79 : vector<4x128xi32>
    %c3_i32 = arith.constant 3 : i32
    %81 = vector.broadcast %c3_i32 : i32 to vector<4x128xi32>
    %82 = arith.andi %80, %81 : vector<4x128xi32>
    %c1_i32_17 = arith.constant 1 : i32
    %83 = vector.broadcast %c1_i32_17 : i32 to vector<4x128xi32>
    %84 = arith.andi %82, %83 : vector<4x128xi32>
    %c1_i32_18 = arith.constant 1 : i32
    %85 = vector.broadcast %c1_i32_18 : i32 to vector<4x128xi32>
    %86 = arith.cmpi eq, %84, %85 : vector<4x128xi32>
    %87 = arith.select %86, %78, %64 : vector<4x128xi1>, vector<4x128xf32>
    %c2_i32 = arith.constant 2 : i32
    %88 = vector.broadcast %c2_i32 : i32 to vector<4x128xi32>
    %89 = arith.cmpi sge, %82, %88 : vector<4x128xi32>
    %cst_19 = arith.constant 0.000000e+00 : f32
    %90 = vector.broadcast %cst_19 : f32 to vector<4x128xf32>
    %91 = arith.subf %90, %87 : vector<4x128xf32>
    %92 = arith.select %89, %91, %87 : vector<4x128xi1>, vector<4x128xf32>
    %c0_20 = arith.constant 0 : index
    %c0_21 = arith.constant 0 : index
    %93 = vector.load %arg3[%c0_20, %c0_21] : memref<4x128xf32, #tpu.memory_space<vmem>>, vector<4x128xf32>
    tpu.vector_store %arg3[%c0_20, %c0_21], %92 {strides = array<i32>} : memref<4x128xf32, #tpu.memory_space<vmem>>, vector<4x128xf32>,
    return
  }
  func.func @transform_0(%arg0: i32) -> (i32, i32) {
    %c0_i32 = arith.constant 0 : i32
    %c0_i32_0 = arith.constant 0 : i32
    return %arg0, %c0_i32 : i32, i32
  }
  func.func @transform_1(%arg0: i32) -> (i32, i32) {
    %c0_i32 = arith.constant 0 : i32
    %c0_i32_0 = arith.constant 0 : i32
    %c0_i32_1 = arith.constant 0 : i32
    return %c0_i32, %c0_i32_0 : i32, i32
  }
  func.func @transform_2(%arg0: i32) -> (i32, i32) {
    %c0_i32 = arith.constant 0 : i32
    %c0_i32_0 = arith.constant 0 : i32
    return %arg0, %c0_i32 : i32, i32
  }
}

</mosaic_0001>

<bundles_post_ra>
// kernel: forward.1
= control target key start
LH: loop header
LB: loop body
LE: loop exit
PB: predicated region body
PF: predicated region fallthrough
CT: control target
= control target key end

     0   :  { %v109_v0 = vmov 0   ;;  %v110_v2 = vmov 2   ;;  %v111_v6 = vmov 1   ;;  %v112_v7 = vmov 3   ;;  %s137_s0 = inlined_call_operand.vmem [shape: s32[4,4], index: 0, kind: input, shape index: {}]   ;;  %s138_s1 = inlined_call_operand.vmem [shape: f32[1,128], index: 1, kind: input, shape index: {}]   ;;  %s139_s2 = inlined_call_operand.vmem [shape: f32[4,128], index: 2, kind: output, shape index: {}]  }
   0x1   :  { %104 = vset.pattern.permute.xlu0 %v109_v0  ;;  %v14_v1 = vld [vmem:[%s137_s0] sm:$0xf]  ;;  %106 = vset.pattern.permute.xlu1 %v110_v2  ;;  %v11_v8 = vlaneseq }
   0x2   :  { %v15_v3 = vcvt.s32.f32 %v14_v1  ;;  %v95_v15 = vld [vmem:[%s138_s1] ss:$0 sm:$0xff] }
   0x3   :  { %v12_v9 = vand.u32 127, %v11_v8 }
   0x4   :  { %v16_v4 = vmax.f32 %v15_v3, 0.0 }
   0x5   :  { %vm23_vm0 = vcmp.ge.s32.totalorder %v12_v9, 32  ;;  %vm31_vm1 = vcmp.ge.s32.totalorder %v12_v9, 64  ;;  %vm39_vm2 = vcmp.ge.s32.totalorder %v12_v9, 96  ;;  %v13_v31 = vand.u32 1, %v12_v9 }
   0x6   :  { %v17_v5 = vmin.f32 %v16_v4, 999.0 }
   0x8   :  { %20 = vperm.xlu0 %104, %v17_v5   ;;  %33 = vperm.xlu1 %106, %v17_v5  }
   0xc   :  { %105 = vset.pattern.permute.xlu0 %v111_v6  ;;  %107 = vset.pattern.permute.xlu1 %v112_v7 }
   0xd   :  { %25 = vperm.xlu0 %105, %v17_v5   ;;  %41 = vperm.xlu1 %107, %v17_v5  }
  0x11   :  { %108 = vset.pattern.permute.xlu0 %v112_v7 }
  0x87   :  { %v21_v10 = vpop.permute.xlu0 %20  ;;  %v34_v11 = vpop.permute.xlu1 %33 }
  0x8c   :  { %v26_v12 = vpop.permute.xlu0 %25  ;;  %v42_v13 = vpop.permute.xlu1 %41 }
  0x8d   :  { %v30_v14 = vsel %vm23_vm0, %v26_v12, %v21_v10 }
  0x8e   :  { %v38_v16 = vsel %vm31_vm1, %v34_v11, %v30_v14 }
  0x8f   :  { %v46_v17 = vsel %vm39_vm2, %v42_v13, %v38_v16 }
  0x90   :  { %v54_v18 = vmul.f32 %v95_v15, %v46_v17 }
  0x92   :  { %v55_v19 = vmul.f32 0.63661975, %v54_v18 }
  0x94   :  { %v56_v20 = vadd.f32 0.5, %v55_v19 }
  0x96   :  { %v98_v21 = vtrunc.f32 %v56_v20 }
  0x98   :  { %v99_v22 = vcvt.f32.s32 %v98_v21 }
  0x9a   :  { %v58_v23 = vcvt.s32.f32 %v99_v22  ;;  %v82_v36 = vadd.s32 %v99_v22, %v13_v31 }
  0x9c   :  { %v59_v24 = vmul.f32 1.5703125, %v58_v23  ;;  %v61_v26 = vmul.f32 0.0004837513, %v58_v23  ;;  %v63_v28 = vmul.f32 7.54979e-08, %v58_v23  ;;  %v83_v41 = vand.u32 3, %v82_v36 }
  0x9e   :  { %v60_v25 = vsub.f32 %v54_v18, %v59_v24  ;;  %v84_v47 = vand.u32 1, %v83_v41  ;;  %vm87_vm4 = vcmp.ge.s32.totalorder %v83_v41, 2 }
  0xa0   :  { %v62_v27 = vsub.f32 %v60_v25, %v61_v26  ;;  %vm85_vm3 = vcmp.eq.s32.totalorder %v84_v47, 1 }
  0xa2   :  { %v64_v29 = vsub.f32 %v62_v27, %v63_v28 }
  0xa4   :  { %v65_v30 = vmul.f32 %v64_v29, %v64_v29 }
  0xa6   :  { %v66_v32 = vmul.f32 -0.00019515296, %v65_v30  ;;  %v73_v33 = vmul.f32 2.4433157e-05, %v65_v30  ;;  %v79_v46 = vmul.f32 0.5, %v65_v30 }
  0xa8   :  { %v67_v34 = vadd.f32 0.008332161, %v66_v32  ;;  %v97_v35 = vadd.f32 -0.0013887316, %v73_v33 }
  0xaa   :  { %v68_v37 = vmul.f32 %v67_v34, %v65_v30  ;;  %v75_v38 = vmul.f32 %v97_v35, %v65_v30 }
  0xac   :  { %v96_v39 = vadd.f32 -0.16666655, %v68_v37  ;;  %v76_v40 = vadd.f32 0.041666646, %v75_v38 }
  0xae   :  { %v70_v42 = vmul.f32 %v96_v39, %v65_v30  ;;  %v77_v43 = vmul.f32 %v76_v40, %v65_v30 }
  0xb0   :  { %v71_v44 = vmul.f32 %v70_v42, %v64_v29  ;;  %v78_v45 = vmul.f32 %v77_v43, %v65_v30 }
  0xb2   :  { %v80_v48 = vsub.f32 %v78_v45, %v79_v46  ;;  %v72_v49 = vadd.f32 %v71_v44, %v64_v29 }
  0xb4   :  { %v81_v50 = vadd.f32 1.0, %v80_v48 }
  0xb6   :  { %v86_v51 = vsel %vm85_vm3, %v81_v50, %v72_v49 }
  0xb7   :  { %v88_v52 = vsub.f32 0.0, %v86_v51 }
  0xb9   :  { %v89_v53 = vsel %vm87_vm4, %v88_v52, %v86_v51 }
  0xba   :  { %90 = vst [vmem:[%s139_s2] sm:$0xf] %v89_v53 }

</bundles_post_ra>
